<compile_context>
chip_gen: v7x
topology: tpu7x:2x2x1
jax: 0.10.0
libtpu: 0.0.40
codegen_flags: <defaults>
</compile_context>

<pallas_src>
import functools

import jax
import jax.numpy as jnp
import numpy as np
from jax.experimental import pallas as pl
from jax.experimental.pallas import tpu as pltpu


def _attention_pooling_kernel(h_ref, maskb_ref, w_ref, b_ref, v_ref, out_ref,
                              m_sc, l_sc, acc_sc, *, use_tanh, score_dtype):
    """One grid step = (block_b batch rows) x (block_s sequence positions).

    Online-softmax accumulation over the S ("arbitrary", innermost) grid axis.

    h_ref:     (Bt, Ss, H)  input tile
    maskb_ref: (Bt, Ss)     additive mask bias (0 = valid, -1e9 = padding)
    w_ref:     (H, Ap)      attention_linear.weight^T (A zero-padded to 128-mult)
    b_ref:     (1, Ap)      attention_linear.bias (f32, zero-padded)
    v_ref:     (1, Ap)      attention_vector (f32, zero-padded)
    out_ref:   (Bt, H)      pooled output (written on the last S step)
    m_sc/l_sc: (Bt, 1) f32  running max / running normalizer
    acc_sc:    (Bt, H) f32  running weighted sum of h
    """
    j = pl.program_id(1)

    @pl.when(j == 0)
    def _init():
        m_sc[...] = jnp.full(m_sc.shape, -jnp.inf, jnp.float32)
        l_sc[...] = jnp.zeros(l_sc.shape, jnp.float32)
        acc_sc[...] = jnp.zeros(acc_sc.shape, jnp.float32)

    bt, ss, hdim = h_ref.shape
    ap = w_ref.shape[1]

    h = h_ref[...]                                           # (Bt, Ss, H)

    # attention_linear: one flattened (Bt*Ss, H) @ (H, Ap) MXU matmul, f32 acc.
    ah = jnp.dot(h.reshape(bt * ss, hdim), w_ref[...],
                 preferred_element_type=jnp.float32)
    ah = ah + b_ref[...]
    if use_tanh:
        # score_dtype=bf16 on v6e/v7x (bf16 activations) halves the EUP tanh
        # cost; v5e has no bf16 VPU/EUP so it stays f32 there.
        ah = jnp.tanh(ah.astype(score_dtype))
    else:
        ah = ah.astype(score_dtype)

    # scores = <tanh(hW + b), v>: VPU multiply + lane (A-axis) reduction,
    # accumulated in f32; zero-padded A columns contribute exactly 0.
    prod = ah.reshape(bt, ss, ap) * v_ref[...].astype(score_dtype)
    sc = jnp.sum(prod.astype(jnp.float32), axis=-1)          # (Bt, Ss), f32
    sc = sc + maskb_ref[...]                                 # additive mask bias

    # Online (numerically stable) softmax update over the S blocks.
    m_prev = m_sc[...]
    m_new = jnp.maximum(m_prev, jnp.max(sc, axis=-1, keepdims=True))
    alpha = jnp.exp(m_prev - m_new)                          # (Bt, 1)
    p = jnp.exp(sc - m_new)                                  # (Bt, Ss)
    l_sc[...] = alpha * l_sc[...] + jnp.sum(p, axis=-1, keepdims=True)
    acc_sc[...] = alpha * acc_sc[...] + jnp.sum(
        h.astype(jnp.float32) * p[:, :, None], axis=1)       # (Bt, H), f32
    m_sc[...] = m_new

    # Dropout on attention weights is identity in eval mode.
    # TODO(synk): training-mode dropout (pltpu.prng_*) not implemented.

    @pl.when(j == pl.num_programs(1) - 1)
    def _finalize():
        inv_l = pl.reciprocal(l_sc[...], approx=True)        # EUP vrcp, ~free
        out_ref[...] = (acc_sc[...] * inv_l).astype(out_ref.dtype)


def _vmem_capacity_bytes():
    try:
        return int(pltpu.get_tpu_info().vmem_capacity_bytes)
    except Exception:
        return 64 * 1024 * 1024          # conservative (v7x per-TC VMEM)


def _is_v5():
    try:
        return "v5" in jax.devices()[0].device_kind.lower()
    except Exception:
        return False


def _pick_blocks(S, H, Ap, in_itemsize, vmem_bytes):
    """VMEM-aware (block_s, max block_b) choice.

    Per-row cost counts double-buffered h/mask/out tiles AND the f32
    intermediates (tanh(hW+b), exp(scores), weighted-h product) plus the
    m/l/acc scratch.  W/b/v are double-buffered at a constant block index, so
    their 2x footprint is subtracted from the budget up front.
    """
    budget = int(vmem_bytes * 0.55)
    budget -= 2 * (H * Ap + 2 * Ap) * 4          # W/bias/v (<= f32), 2 buffers
    budget = max(budget, 1 << 20)

    def per_row(bs):
        return (2 * bs * H * in_itemsize         # h tile, double-buffered
                + 2 * bs * 4                     # mask-bias tile, double-buffered
                + bs * Ap * 4                    # tanh(hW + b) f32 intermediate
                + 3 * bs * 4                     # scores / exp temporaries
                + bs * H * 4                     # f32 weighted-h product
                + 2 * H * in_itemsize            # out tile, double-buffered
                + (H + 2) * 4)                   # m / l / acc scratch

    # block_s: largest divisor of S (multiple of 8 when possible, <= 1024)
    # whose footprint for 8 batch rows still fits the budget.
    cands = [d for d in range(min(S, 1024), 0, -1)
             if S % d == 0 and (d % 8 == 0 or d == S)]
    block_s = cands[-1]
    for bs in cands:
        if per_row(bs) * 8 <= budget:
            block_s = bs
            break

    max_bb = max(8, (budget // per_row(block_s)) // 8 * 8)
    return block_s, max_bb


def _pick_block_b(B, max_bb):
    """Batch tile: multiple of 8 (or == B), divisor of B when possible (avoids
    the HBM-side pad copy), preferring an even grid-step count so both v7x
    TensorCores get balanced work on the 'parallel' batch axis."""
    if B <= max_bb:
        if B >= 16 and (B // 2) % 8 == 0:
            return B // 2                        # 2 balanced steps, no padding
        return B                                 # 1 step, block == full dim
    best = None
    for d in range(max_bb, 7, -8):               # max_bb is a multiple of 8
        if B % d == 0:
            if (B // d) % 2 == 0:
                return d                         # even step count
            if best is None:
                best = d
    if best is not None:
        return best
    # No multiple-of-8 divisor fits VMEM: fall back to padding the batch.
    return max_bb


def attention_pooling(hidden_states, attention_mask, weight_t, bias, attn_vec,
                      *, use_tanh=True, block_b=None, block_s=None,
                      score_dtype=None, vmem_limit_bytes=None):
    """hidden_states: [B, S, H]; attention_mask: [B, S] (1 valid / 0 pad) or None;
       weight_t: [H, A] (= attention_linear.weight.T); bias: [A]; attn_vec: [A]
       -> pooled output [B, H]."""
    B, S, H = hidden_states.shape
    A = weight_t.shape[1]
    dtype = hidden_states.dtype
    itemsize = jnp.dtype(dtype).itemsize

    # Pad A to a lane multiple of 128 (identity: tanh(0) = 0 and v_pad = 0).
    Ap = ((A + 127) // 128) * 128
    pad_a = Ap - A
    w = weight_t.astype(dtype)                   # bf16-native MXU when bf16 input
    if pad_a:
        w = jnp.pad(w, ((0, 0), (0, pad_a)))
    b2 = jnp.pad(bias.astype(jnp.float32), (0, pad_a)).reshape(1, Ap)
    v2 = jnp.pad(attn_vec.astype(jnp.float32), (0, pad_a)).reshape(1, Ap)

    # Additive, lane-dense mask bias: valid -> 0, padding -> -1e9 (no select).
    if attention_mask is None:
        mask_bias = jnp.zeros((B, S), dtype=jnp.float32)
    else:
        mask_bias = (attention_mask.astype(jnp.float32) - 1.0) * 1e9

    # Post-matmul tanh/score precision (see kernel comment).
    if score_dtype is None:
        score_dtype = (jnp.bfloat16
                       if (dtype == jnp.bfloat16 and not _is_v5())
                       else jnp.float32)

    vmem_cap = _vmem_capacity_bytes()
    if vmem_limit_bytes is None:
        vmem_limit_bytes = min(int(vmem_cap * 0.75), 100 * 1024 * 1024)

    auto_bs, max_bb = _pick_blocks(S, H, Ap, itemsize, vmem_cap)
    if block_s is None:
        block_s = auto_bs
    if block_b is None:
        block_b = _pick_block_b(B, max_bb)

    grid_b = pl.cdiv(B, block_b)
    grid_s = pl.cdiv(S, block_s)
    Bp = grid_b * block_b
    Sp = grid_s * block_s
    if Sp != S:
        # Only with a user-supplied block_s that doesn't divide S: padded
        # positions get a -1e9 bias so they receive ~zero attention weight.
        hidden_states = jnp.pad(hidden_states, ((0, 0), (0, Sp - S), (0, 0)))
        mask_bias = jnp.pad(mask_bias, ((0, 0), (0, Sp - S)),
                            constant_values=-1e9)
    if Bp != B:
        # Rare fallback (no multiple-of-8 divisor of B fits VMEM); this pad is
        # a full HBM read+write of hidden_states, so divisor block_b is
        # preferred whenever possible.
        hidden_states = jnp.pad(hidden_states, ((0, Bp - B), (0, 0), (0, 0)))
        mask_bias = jnp.pad(mask_bias, ((0, Bp - B), (0, 0)))

    kernel = functools.partial(_attention_pooling_kernel,
                               use_tanh=use_tanh, score_dtype=score_dtype)

    out = pl.pallas_call(
        kernel,
        out_shape=jax.ShapeDtypeStruct((Bp, H), dtype),
        grid_spec=pltpu.PrefetchScalarGridSpec(
            num_scalar_prefetch=0,
            grid=(grid_b, grid_s),
            in_specs=[
                pl.BlockSpec((block_b, block_s, H), lambda i, j: (i, j, 0)),
                pl.BlockSpec((block_b, block_s), lambda i, j: (i, j)),
                pl.BlockSpec((H, Ap), lambda i, j: (0, 0)),
                pl.BlockSpec((1, Ap), lambda i, j: (0, 0)),
                pl.BlockSpec((1, Ap), lambda i, j: (0, 0)),
            ],
            out_specs=pl.BlockSpec((block_b, H), lambda i, j: (i, 0)),
            scratch_shapes=[
                pltpu.VMEM((block_b, 1), jnp.float32),   # running max m
                pltpu.VMEM((block_b, 1), jnp.float32),   # running normalizer l
                pltpu.VMEM((block_b, H), jnp.float32),   # running accumulator
            ],
        ),
        compiler_params=pltpu.CompilerParams(
            dimension_semantics=("parallel", "arbitrary"),
            vmem_limit_bytes=vmem_limit_bytes),
    )(hidden_states, mask_bias, w, b2, v2)

    return out[:B]


def reference(hidden_states, attention_mask, weight_t, bias, attn_vec):
    ah = jnp.tanh(jnp.einsum("bsh,ha->bsa", hidden_states, weight_t) + bias)
    scores = jnp.einsum("bsa,a->bs", ah, attn_vec)
    scores = jnp.where(attention_mask == 0, -1e9, scores)
    w = jax.nn.softmax(scores, axis=1)
    return jnp.sum(hidden_states * w[..., None], axis=1)


if __name__ == "__main__":
    B, S, H = 16, 16, 32
    A = H  # attention_dim defaults to hidden_dim

    key = jax.random.PRNGKey(0)
    k_x, k_w, k_v = jax.random.split(key, 3)

    # Inputs
    x = jax.random.normal(k_x, (B, S, H), dtype=jnp.float32)
    # mask: every other row has padding in its last 5 positions
    mask = jnp.ones((B, S), dtype=jnp.int32)
    mask = mask.at[1::2, S - 5:].set(0)

    # Parameters (deterministic init, mirrors _init_weights)
    bound = float(np.sqrt(6.0 / (H + A)))                 # xavier_uniform bound
    w = jax.random.uniform(k_w, (A, H), minval=-bound, maxval=bound,
                           dtype=jnp.float32)             # PyTorch layout [A, H]
    weight_t = w.T                                        # kernel layout [H, A]
    bias = jnp.zeros((A,), dtype=jnp.float32)
    attn_vec = 0.1 * jax.random.normal(k_v, (A,), dtype=jnp.float32)

    out = attention_pooling(x, mask, weight_t, bias, attn_vec)
    out = jax.block_until_ready(out)

    ref = reference(x, mask, weight_t, bias, attn_vec)
    # Tolerance accounts for the EUP approximate reciprocal used for the
    # softmax normalizer (pl.reciprocal(..., approx=True)).
    np.testing.assert_allclose(np.asarray(out), np.asarray(ref),
                               rtol=2e-3, atol=2e-3)
    print("KERNEL_OK")
</pallas_src>

<mosaic_0001>
module attributes {stable_mosaic.version = 11 : i64} {
  func.func @_attention_pooling_kernel(%arg0: i32, %arg1: i32, %arg2: memref<8x16x32xf32, #tpu.memory_space<vmem>>, %arg3: memref<8x16xf32, #tpu.memory_space<vmem>>, %arg4: memref<32x128xf32, #tpu.memory_space<vmem>>, %arg5: memref<1x128xf32, #tpu.memory_space<vmem>>, %arg6: memref<1x128xf32, #tpu.memory_space<vmem>>, %arg7: memref<8x32xf32, #tpu.memory_space<vmem>>, %arg8: memref<8x1xf32, #tpu.memory_space<vmem>>, %arg9: memref<8x1xf32, #tpu.memory_space<vmem>>, %arg10: memref<8x32xf32, #tpu.memory_space<vmem>>) attributes {dimension_semantics = [#tpu.dimension_semantics<parallel>, #tpu.dimension_semantics<arbitrary>], iteration_bounds = array<i64: 2, 1>, scalar_prefetch = 0 : i64, scratch_operands = 3 : i64, tpu.core_type = #tpu.core_type<tc>, window_params = [{transform_indices = @transform_0, window_bounds = array<i64: 8, 16, 32>}, {transform_indices = @transform_1, window_bounds = array<i64: 8, 16>}, {pipeline_mode = #tpu.pipeline_mode<synchronous>, transform_indices = @transform_2, window_bounds = array<i64: 32, 128>}, {pipeline_mode = #tpu.pipeline_mode<synchronous>, transform_indices = @transform_3, window_bounds = array<i64: 1, 128>}, {pipeline_mode = #tpu.pipeline_mode<synchronous>, transform_indices = @transform_4, window_bounds = array<i64: 1, 128>}, {transform_indices = @transform_5, window_bounds = array<i64: 8, 32>}]} {
    %c0_i32 = arith.constant 0 : i32
    %0 = arith.cmpi eq, %arg1, %c0_i32 : i32
    %1 = arith.extui %0 : i1 to i32
    %c0_i32_0 = arith.constant 0 : i32
    %2 = arith.cmpi ne, %1, %c0_i32_0 : i32
    scf.if %2 {
      %cst_29 = arith.constant 0xFF800000 : f32
      %47 = vector.broadcast %cst_29 : f32 to vector<8x1xf32>
      %c0_30 = arith.constant 0 : index
      %c0_31 = arith.constant 0 : index
      %48 = vector.load %arg8[%c0_30, %c0_31] : memref<8x1xf32, #tpu.memory_space<vmem>>, vector<8x1xf32>
      tpu.vector_store %arg8[%c0_30, %c0_31], %47 {strides = array<i32>} : memref<8x1xf32, #tpu.memory_space<vmem>>, vector<8x1xf32>,
      %cst_32 = arith.constant 0.000000e+00 : f32
      %49 = vector.broadcast %cst_32 : f32 to vector<8x1xf32>
      %c0_33 = arith.constant 0 : index
      %c0_34 = arith.constant 0 : index
      %50 = vector.load %arg9[%c0_33, %c0_34] : memref<8x1xf32, #tpu.memory_space<vmem>>, vector<8x1xf32>
      tpu.vector_store %arg9[%c0_33, %c0_34], %49 {strides = array<i32>} : memref<8x1xf32, #tpu.memory_space<vmem>>, vector<8x1xf32>,
      %cst_35 = arith.constant 0.000000e+00 : f32
      %51 = vector.broadcast %cst_35 : f32 to vector<8x32xf32>
      %c0_36 = arith.constant 0 : index
      %c0_37 = arith.constant 0 : index
      %52 = vector.load %arg10[%c0_36, %c0_37] : memref<8x32xf32, #tpu.memory_space<vmem>>, vector<8x32xf32>
      tpu.vector_store %arg10[%c0_36, %c0_37], %51 {strides = array<i32>} : memref<8x32xf32, #tpu.memory_space<vmem>>, vector<8x32xf32>,
    } else {
    }
    %c0 = arith.constant 0 : index
    %c0_1 = arith.constant 0 : index
    %c0_2 = arith.constant 0 : index
    %3 = vector.load %arg2[%c0, %c0_1, %c0_2] : memref<8x16x32xf32, #tpu.memory_space<vmem>>, vector<8x16x32xf32>
    %4 = vector.shape_cast %3 : vector<8x16x32xf32> to vector<128x32xf32>
    %c0_3 = arith.constant 0 : index
    %c0_4 = arith.constant 0 : index
    %5 = vector.load %arg4[%c0_3, %c0_4] : memref<32x128xf32, #tpu.memory_space<vmem>>, vector<32x128xf32>
    %cst = arith.constant dense<0.000000e+00> : vector<128x128xf32>
    %6 = tpu.matmul %4, %5, %cst {dimension_numbers = #tpu.dot_dimension_numbers<[1], [0], [0], [1], [0, 0, 1, 1], [], []>} : vector<128x32xf32>, vector<32x128xf32>, vector<128x128xf32> -> vector<128x128xf32>
    %c0_5 = arith.constant 0 : index
    %c0_6 = arith.constant 0 : index
    %7 = vector.load %arg5[%c0_5, %c0_6] : memref<1x128xf32, #tpu.memory_space<vmem>>, vector<1x128xf32>
    %8 = vector.broadcast %7 : vector<1x128xf32> to vector<128x128xf32>
    %9 = arith.addf %6, %8 : vector<128x128xf32>
    %10 = math.tanh %9 : vector<128x128xf32>
    %11 = vector.shape_cast %10 : vector<128x128xf32> to vector<8x16x128xf32>
    %c0_7 = arith.constant 0 : index
    %c0_8 = arith.constant 0 : index
    %12 = vector.load %arg6[%c0_7, %c0_8] : memref<1x128xf32, #tpu.memory_space<vmem>>, vector<1x128xf32>
    %13 = vector.shape_cast %12 : vector<1x128xf32> to vector<1x1x128xf32>
    %14 = vector.broadcast %13 : vector<1x1x128xf32> to vector<8x16x128xf32>
    %15 = arith.mulf %11, %14 : vector<8x16x128xf32>
    %cst_9 = arith.constant dense<0.000000e+00> : vector<8x16xf32>
    %16 = vector.multi_reduction <add>, %15, %cst_9 [2] : vector<8x16x128xf32> to vector<8x16xf32>
    %c0_10 = arith.constant 0 : index
    %c0_11 = arith.constant 0 : index
    %17 = vector.load %arg3[%c0_10, %c0_11] : memref<8x16xf32, #tpu.memory_space<vmem>>, vector<8x16xf32>
    %18 = arith.addf %16, %17 : vector<8x16xf32>
    %c0_12 = arith.constant 0 : index
    %c0_13 = arith.constant 0 : index
    %19 = vector.load %arg8[%c0_12, %c0_13] : memref<8x1xf32, #tpu.memory_space<vmem>>, vector<8x1xf32>
    %cst_14 = arith.constant dense<0xFF800000> : vector<8xf32>
    %20 = vector.multi_reduction <maximumf>, %18, %cst_14 [1] : vector<8x16xf32> to vector<8xf32>
    %21 = vector.shape_cast %20 : vector<8xf32> to vector<8x1xf32>
    %22 = arith.maximumf %19, %21 : vector<8x1xf32>
    %23 = arith.subf %19, %22 : vector<8x1xf32>
    %24 = math.exp %23 : vector<8x1xf32>
    %25 = vector.broadcast %22 : vector<8x1xf32> to vector<8x16xf32>
    %26 = arith.subf %18, %25 : vector<8x16xf32>
    %27 = math.exp %26 : vector<8x16xf32>
    %c0_15 = arith.constant 0 : index
    %c0_16 = arith.constant 0 : index
    %28 = vector.load %arg9[%c0_15, %c0_16] : memref<8x1xf32, #tpu.memory_space<vmem>>, vector<8x1xf32>
    %29 = arith.mulf %24, %28 : vector<8x1xf32>
    %cst_17 = arith.constant dense<0.000000e+00> : vector<8xf32>
    %30 = vector.multi_reduction <add>, %27, %cst_17 [1] : vector<8x16xf32> to vector<8xf32>
    %31 = vector.shape_cast %30 : vector<8xf32> to vector<8x1xf32>
    %32 = arith.addf %29, %31 : vector<8x1xf32>
    %c0_18 = arith.constant 0 : index
    %c0_19 = arith.constant 0 : index
    %33 = vector.load %arg9[%c0_18, %c0_19] : memref<8x1xf32, #tpu.memory_space<vmem>>, vector<8x1xf32>
    tpu.vector_store %arg9[%c0_18, %c0_19], %32 {strides = array<i32>} : memref<8x1xf32, #tpu.memory_space<vmem>>, vector<8x1xf32>,
    %c0_20 = arith.constant 0 : index
    %c0_21 = arith.constant 0 : index
    %34 = vector.load %arg10[%c0_20, %c0_21] : memref<8x32xf32, #tpu.memory_space<vmem>>, vector<8x32xf32>
    %35 = vector.broadcast %24 : vector<8x1xf32> to vector<8x32xf32>
    %36 = arith.mulf %35, %34 : vector<8x32xf32>
    %37 = vector.shape_cast %27 : vector<8x16xf32> to vector<8x16x1xf32>
    %38 = vector.broadcast %37 : vector<8x16x1xf32> to vector<8x16x32xf32>
    %39 = arith.mulf %3, %38 : vector<8x16x32xf32>
    %cst_22 = arith.constant dense<0.000000e+00> : vector<8x32xf32>
    %40 = vector.multi_reduction <add>, %39, %cst_22 [1] : vector<8x16x32xf32> to vector<8x32xf32>
    %41 = arith.addf %36, %40 : vector<8x32xf32>
    %c0_23 = arith.constant 0 : index
    %c0_24 = arith.constant 0 : index
    %42 = vector.load %arg10[%c0_23, %c0_24] : memref<8x32xf32, #tpu.memory_space<vmem>>, vector<8x32xf32>
    tpu.vector_store %arg10[%c0_23, %c0_24], %41 {strides = array<i32>} : memref<8x32xf32, #tpu.memory_space<vmem>>, vector<8x32xf32>,
    %c0_25 = arith.constant 0 : index
    %c0_26 = arith.constant 0 : index
    %43 = vector.load %arg8[%c0_25, %c0_26] : memref<8x1xf32, #tpu.memory_space<vmem>>, vector<8x1xf32>
    tpu.vector_store %arg8[%c0_25, %c0_26], %22 {strides = array<i32>} : memref<8x1xf32, #tpu.memory_space<vmem>>, vector<8x1xf32>,
    %c0_i32_27 = arith.constant 0 : i32
    %44 = arith.cmpi eq, %arg1, %c0_i32_27 : i32
    %45 = arith.extui %44 : i1 to i32
    %c0_i32_28 = arith.constant 0 : i32
    %46 = arith.cmpi ne, %45, %c0_i32_28 : i32
    scf.if %46 {
      %c0_29 = arith.constant 0 : index
      %c0_30 = arith.constant 0 : index
      %47 = vector.load %arg9[%c0_29, %c0_30] : memref<8x1xf32, #tpu.memory_space<vmem>>, vector<8x1xf32>
      %48 = tpu.reciprocal %47 {approx = true} : vector<8x1xf32> -> vector<8x1xf32>
      %c0_31 = arith.constant 0 : index
      %c0_32 = arith.constant 0 : index
      %49 = vector.load %arg10[%c0_31, %c0_32] : memref<8x32xf32, #tpu.memory_space<vmem>>, vector<8x32xf32>
      %50 = vector.broadcast %48 : vector<8x1xf32> to vector<8x32xf32>
      %51 = arith.mulf %49, %50 : vector<8x32xf32>
      %c0_33 = arith.constant 0 : index
      %c0_34 = arith.constant 0 : index
      %52 = vector.load %arg7[%c0_33, %c0_34] : memref<8x32xf32, #tpu.memory_space<vmem>>, vector<8x32xf32>
      tpu.vector_store %arg7[%c0_33, %c0_34], %51 {strides = array<i32>} : memref<8x32xf32, #tpu.memory_space<vmem>>, vector<8x32xf32>,
    } else {
    }
    return
  }
  func.func @transform_0(%arg0: i32, %arg1: i32) -> (i32, i32, i32) {
    %c0_i32 = arith.constant 0 : i32
    %c0_i32_0 = arith.constant 0 : i32
    return %arg0, %arg1, %c0_i32 : i32, i32, i32
  }
  func.func @transform_1(%arg0: i32, %arg1: i32) -> (i32, i32) {
    %c0_i32 = arith.constant 0 : i32
    return %arg0, %arg1 : i32, i32
  }
  func.func @transform_2(%arg0: i32, %arg1: i32) -> (i32, i32) {
    %c0_i32 = arith.constant 0 : i32
    %c0_i32_0 = arith.constant 0 : i32
    %c0_i32_1 = arith.constant 0 : i32
    return %c0_i32, %c0_i32_0 : i32, i32
  }
  func.func @transform_3(%arg0: i32, %arg1: i32) -> (i32, i32) {
    %c0_i32 = arith.constant 0 : i32
    %c0_i32_0 = arith.constant 0 : i32
    %c0_i32_1 = arith.constant 0 : i32
    return %c0_i32, %c0_i32_0 : i32, i32
  }
  func.func @transform_4(%arg0: i32, %arg1: i32) -> (i32, i32) {
    %c0_i32 = arith.constant 0 : i32
    %c0_i32_0 = arith.constant 0 : i32
    %c0_i32_1 = arith.constant 0 : i32
    return %c0_i32, %c0_i32_0 : i32, i32
  }
  func.func @transform_5(%arg0: i32, %arg1: i32) -> (i32, i32) {
    %c0_i32 = arith.constant 0 : i32
    %c0_i32_0 = arith.constant 0 : i32
    return %arg0, %c0_i32 : i32, i32
  }
}

</mosaic_0001>

<bundles_post_ra>
// kernel: tpu_custom_call.1
= control target key start
LH: loop header
LB: loop body
LE: loop exit
PB: predicated region body
PF: predicated region fallthrough
CT: control target
= control target key end

     0   :  { %s2563_s0 = inlined_call_operand.hbm [shape: f32[16,16,32], index: 0, kind: input, shape index: {}]   ;;  %s2564_s1 = inlined_call_operand.hbm [shape: f32[16,16], index: 1, kind: input, shape index: {}]   ;;  %s2565_s2 = inlined_call_operand.hbm [shape: f32[32,128], index: 2, kind: input, shape index: {}]   ;;  %s2566_s3 = inlined_call_operand.vmem [shape: f32[1,128], index: 3, kind: input, shape index: {}]   ;;  %s2567_s4 = inlined_call_operand.vmem [shape: f32[1,128], index: 4, kind: input, shape index: {}]   ;;  %s2568_s5 = inlined_call_operand.hbm [shape: f32[16,32], index: 5, kind: output, shape index: {}]  }
   0x1   :  { %2578 = sst [smem:[#allocation19_spill]] %s2563_s0 }
   0x2   :  { %2579 = sst [smem:[#allocation20_spill]] %s2565_s2 }
   0x3   :  { %10 = vsyncpa [#allocation6], 0 }
   0x4   :  { %12 = vsyncpa [#allocation6 + $0x1], 0 }
   0x5   :  { %13 = vsyncpa [#allocation9], 0 }
   0x6   :  { %15 = vsyncpa [#allocation9 + $0x1], 0 }
   0x7   :  { %16 = vsyncpa [#allocation7], 0 }
   0x8   :  { %18 = vsyncpa [#allocation7 + $0x1], 0  ;;  %s1894_s18 = smov 0   ;;  %s1896_s19 = smov 0  }
   0x9   :  { %s1898_s20 = smov 0   ;;  %s1900_s21 = smov 0  }
   0xa   :  { %s1902_s22 = smov 0   ;;  %s1904_s23 = smov 0  }
   0xb LB: > { %2580 = sst [smem:[#allocation16_spill]] %s1841_s20  ;;  %s1925_s24 = sadd.s32 4294967295, %s1853_s23   ;;  %s1853_s23 = sphi %s1904_s23, %s24_s23   ;;  %s1849_s22 = sphi %s1902_s22, %s2610_s22   ;;  %s1845_s21 = sphi %s1900_s21, %s2609_s21   ;;  %s1841_s20 = sphi %s1898_s20, %s2605_s20   ;;  %s1837_s19 = sphi %s1896_s19, %s2608_s19   ;;  %s1833_s18 = sphi %s1894_s18, %s2607_s18  }
   0xc   : > { %s1419_s25 = sadd.s32 4294967294, %s1853_s23   ;;  %p58_p0 = scmp.ne.s32.totalorder %s1837_s19, %s1833_s18 }
   0xd   : > { %p2569_p1 = scmp.eq.s32.totalorder %s1925_s24, 0  ;;  %p179_p3 = scmp.eq.s32.totalorder %s1419_s25, 1 }
   0xe   : > { %p1420_p5 = scmp.ge.s32.totalorder %s1853_s23, 1  ;;  %p186_p7 = scmp.lt.s32.totalorder %s1853_s23, 3 }
   0xf   : > { %p1934_p4 = por %p2569_p1, %p58_p0  ;;  %p1939_p6 = por %p179_p3, %p58_p0 }
  0x10   : > { %p1944_p8 = pnand %p1420_p5, %p186_p7  ;;  %s1855_s29 = smov [#allocation10]  }
  0x11   : > { %s2581_s26 = scalar_select %p1934_p4, 1, 0 }
  0x12   : > { %s2582_s27 = scalar_select %p1939_p6, 1, 0 }
  0x13   : > { %s2583_s28 = scalar_select %p1944_p8, 1, 0 }
  0x14   : > { %s198_s30 = sshll.u32 %s1855_s29, 4  ;;  %p1532_p9 = pneg %p1944_p8  ;;  %s199_s30 = int_to_ptr.vmem [resolvable:$true] %s198_s30 }
  0x15   : > { %s36_s7 = sadd.s32 1, %s1849_s22  ;;  %s2585_s2 = sld [smem:[#allocation20_spill]] }
  0x16   : > { %p1953_p11 = pnand %p1532_p9, %p2569_p1 }
  0x18   : > { %p1677_p13 = pneg %p1953_p11 }
  0x1b   : > { %s1675_s10 = scalar_lea.hbm %s2585_s2, 512 }
  0x1c   : > { %p1676_p12 = scmp.ne.s32.totalorder %s2585_s2, %s1675_s10  ;;  %p1682_p5 = scmp.lt.u32.totalorder %s1675_s10, %s2585_s2 }
  0x1e   : > { %p1678_p0 = pnand %p1677_p13, %p1676_p12 }
  0x20   : > { %p1679_p3 = pneg %p1678_p0 }
  0x22   : > { %p1684_p7 = pnand %p1682_p5, %p1679_p3 }
  0x24   : > { %1687 = shalt.err (!%p1684_p7)
}
  0x25   : > { %s1688_s15 = scalar_lea.vmem %s199_s30, 512  ;;  %p1696_p2 = scmp.lt.s32.totalorder %s199_s30, %s199_s30 }
  0x26   : > { %p1689_p9 = scmp.ne.s32.totalorder %s199_s30, %s1688_s15  ;;  %p1697_p6 = scmp.lt.s32.totalorder %s1688_s15, %s1688_s15 }
  0x28   : > { %p1691_p10 = pnand %p1689_p9, %p1677_p13  ;;  %p1698_p4 = por %p1697_p6, %p1696_p2 }
  0x2a   : > { %p1692_p1 = pneg %p1691_p10 }
  0x2c   : > { %p1699_p8 = pnand %p1698_p4, %p1692_p1 }
  0x2e   : > { %1702 = shalt.err (!%p1699_p8)
}
  0x2f   : > { %s2572_s16 = smov 128   ;;  %s2573_s17 = smov 8  }
  0x30   : > { %1535 = dma.hbm_to_vmem [thread:$0]  (!%p1953_p11), %s2585_s2, 512, %s199_s30, [#allocation9], %s2572_s16, %s2572_s16, %s2573_s17  }
  0x31   : > { %p38_p1 = scmp.ge.s32.totalorder %s36_s7, 2  ;;  %s45_s8 = sadd.s32 1, %s1841_s20 }
  0x32   : > { %p52_p2 = scmp.ne.s32.totalorder %s1841_s20, %s1837_s19  ;;  %p53_p4 = scmp.eq.s32.totalorder %s1853_s23, 0 }
  0x33   : > { %s2612_s7 = smov (%p38_p1, %s36_s7), 0  ;;  %p2588_p8 = scmp.eq.s32.totalorder %s1925_s24, 1 }
  0x34   : > { %2586 = sst [smem:[#allocation17_spill]] %s2612_s7  ;;  %p1983_p6 = por %p53_p4, %p52_p2 }
  0x35   : > { %p1989_p10 = por %p2588_p8, %p52_p2  ;;  %s40_s10 = ssub.s32 %s1849_s22, %s2612_s7 }
  0x36   : > { %p1548_p11 = scmp.lt.s32.totalorder %s1853_s23, 2  ;;  %p43_p12 = scmp.eq.s32.totalorder %s40_s10, 0 }
  0x37   : > { %s2589_s6 = scalar_select %p1989_p10, 1, 0 }
  0x38   : > { %s1997_s30 = sand.u32 1, %s1841_s20   ;;  %s1457_s13 = sshll.u32 %s1849_s22, 11 }
  0x39   : > { %s1423_s11 = sshll.u32 %s1997_s30, 7  ;;  %s2591_s0 = sld [smem:[#allocation19_spill]] }
  0x3a   : > { %s2001_s12 = scalar_select %p43_p12, %s1841_s20, %s45_s8  }
  0x3b   : > { %s222_s29 = scalar_lea.vmem [#allocation5], %s1423_s11  ;;  %p2013_p13 = pnand %p1548_p11, %p1983_p6 }
  0x3c   : > { %2590 = sst [smem:[#allocation18_spill]] %s2001_s12  ;;  %s232_s10 = sshll.u32 %s222_s29, 4  ;;  %s2009_s10 = int_to_ptr.vmem [resolvable:$true] %s232_s10 }
  0x3d   : > { %s1427_s17 = sshll.u32 %s1997_s30, 3  ;;  %s219_s14 = scalar_lea.sflag [#allocation6], %s1997_s30 }
  0x3e   : > { %p1705_p3 = pneg %p2013_p13 }
  0x3f   : > { %s2007_s25 = scalar_lea.hbm %s2591_s0, %s1457_s13  ;;  %s1708_s9 = scalar_lea.hbm %s2591_s0, 4096 }
  0x40   : > { %s1703_s13 = scalar_lea.hbm %s2007_s25, 2048  ;;  %p1709_p9 = scmp.lt.u32.totalorder %s2007_s25, %s2591_s0 }
  0x41   : > { %p1704_p0 = scmp.ne.s32.totalorder %s2007_s25, %s1703_s13  ;;  %p1710_p1 = scmp.lt.u32.totalorder %s1708_s9, %s1703_s13 }
  0x42   : > { %p1712_p4 = scmp.lt.u32.totalorder %s1703_s13, %s2007_s25 }
  0x43   : > { %p1706_p5 = pnand %p1705_p3, %p1704_p0  ;;  %p1711_p2 = por %p1710_p1, %p1709_p9 }
  0x45   : > { %p1707_p7 = pneg %p1706_p5  ;;  %p1713_p6 = por %p1712_p4, %p1711_p2 }
  0x47   : > { %p1714_p8 = pnand %p1713_p6, %p1707_p7 }
  0x49   : > { %1717 = shalt.err (!%p1714_p8)
}
  0x4a   : > { %s1718_s8 = scalar_lea.vmem %s2009_s10, 2048  ;;  %s1858_s11 = smov [#allocation5]  }
  0x4b   : > { %p1719_p11 = scmp.ne.s32.totalorder %s2009_s10, %s1718_s8  ;;  %s1723_s15 = sshll.u32 %s1858_s11, 4  ;;  %s1724_s15 = int_to_ptr.vmem [resolvable:$false] %s1723_s15 }
  0x4c   : > { %s1725_s2 = scalar_lea.vmem %s1724_s15, 4096  ;;  %p1726_p5 = scmp.lt.s32.totalorder %s2009_s10, %s1724_s15 }
  0x4d   : > { %p1721_p12 = pnand %p1719_p11, %p1705_p3  ;;  %p1727_p9 = scmp.lt.s32.totalorder %s1725_s2, %s1718_s8 }
  0x4f   : > { %p1722_p0 = pneg %p1721_p12  ;;  %p1728_p1 = por %p1727_p9, %p1726_p5 }
  0x51   : > { %p1729_p2 = pnand %p1728_p1, %p1722_p0 }
  0x53   : > { %1732 = shalt.err (!%p1729_p2)
}
  0x54   : > { %s2593_s13 = smov 8   ;;  %s2594_s9 = smov 128  }
  0x55   : > { %1539 = dma.hbm_to_vmem [thread:$0]  (!%p2013_p13), %s2007_s25, 2048, %s2009_s10, %s219_s14, %s2594_s9, %s2594_s9, %s2593_s13  }
  0x56   : > { %s1428_s29 = sshll.u32 %s1849_s22, 7  ;;  %s246_s2 = scalar_lea.vmem [#allocation8], %s1427_s17 }
  0x57   : > { %s2054_s15 = scalar_lea.hbm %s2564_s1, %s1428_s29  ;;  %s254_s0 = sshll.u32 %s246_s2, 4  ;;  %s255_s0 = int_to_ptr.vmem [resolvable:$true] %s254_s0 }
  0x58   : > { %s2595_s7 = sand.u32 1, %s1853_s23   ;;  %s1733_s20 = scalar_lea.hbm %s2054_s15, 128 }
  0x59   : > { %s243_s12 = scalar_lea.sflag [#allocation9], %s2595_s7  ;;  %p1734_p7 = scmp.ne.s32.totalorder %s2054_s15, %s1733_s20 }
  0x5a   : > { %s1738_s14 = scalar_lea.hbm %s2564_s1, 256  ;;  %p1739_p8 = scmp.lt.u32.totalorder %s2054_s15, %s2564_s1 }
  0x5b   : > { %p1736_p4 = pnand %p1734_p7, %p1705_p3  ;;  %p1740_p11 = scmp.lt.u32.totalorder %s1738_s14, %s1733_s20 }
  0x5c   : > { %p1742_p0 = scmp.lt.u32.totalorder %s1733_s20, %s2054_s15 }
  0x5d   : > { %p1737_p6 = pneg %p1736_p4  ;;  %p1741_p12 = por %p1740_p11, %p1739_p8 }
  0x5f   : > { %p1743_p5 = por %p1742_p0, %p1741_p12 }
  0x61   : > { %p1744_p9 = pnand %p1743_p5, %p1737_p6 }
  0x63   : > { %1747 = shalt.err (!%p1744_p9)
}
  0x64   : > { %s1748_s7 = scalar_lea.vmem %s255_s0, 128  ;;  %s1859_s17 = smov [#allocation8]  }
  0x65   : > { %p1749_p1 = scmp.ne.s32.totalorder %s255_s0, %s1748_s7  ;;  %s1753_s9 = sshll.u32 %s1859_s17, 4  ;;  %s1754_s9 = int_to_ptr.vmem [resolvable:$false] %s1753_s9 }
  0x66   : > { %s1755_s29 = scalar_lea.vmem %s1754_s9, 256  ;;  %p1756_p4 = scmp.lt.s32.totalorder %s255_s0, %s1754_s9 }
  0x67   : > { %p1751_p2 = pnand %p1749_p1, %p1705_p3  ;;  %p1757_p10 = scmp.lt.s32.totalorder %s1755_s29, %s1748_s7 }
  0x69   : > { %p1752_p7 = pneg %p1751_p2  ;;  %p1758_p8 = por %p1757_p10, %p1756_p4 }
  0x6b   : > { %p1759_p11 = pnand %p1758_p8, %p1752_p7 }
  0x6d   : > { %1762 = shalt.err (!%p1759_p11)
}
  0x6e   : > { %1542 = dma.hbm_to_vmem [thread:$0]  (!%p2013_p13), %s2054_s15, 128, %s255_s0, %s243_s12  }
  0x6f   : > { %p2596_p6 = scmp.ne.s32.totalorder %s2583_s28, 0 }
  0x70   : > { %s2082_s20 = sand.u32 (!%p2596_p6), 1, %s1837_s19   ;;  %p2597_p10 = scmp.ne.s32.totalorder (!%p2596_p6), %s2581_s26, 0 }
  0x71   : > { %263 = sbr.rel (%p2596_p6) target bundleno = 1457 (0x5b1), region = 40  ;;  %s1430_s11 = sshll.u32 (!%p2596_p6), %s2082_s20, 7 }
  0x72   : > { %s266_s8 = scalar_lea.sflag (!%p2596_p6), [#allocation6], %s2082_s20  ;;  %s2086_s2 = scalar_lea.vmem (!%p2596_p6), [#allocation5], %s1430_s11 }
  0x78   : > { %1816 = dma.done.wait (%p2597_p10), %s266_s8, 2048  }
  0x79   : > { %1818 = vsyncadd (%p2597_p10), %s266_s8, 4294965248  ;;  %s274_s0 = sand.u32 1, %s1925_s24   ;;  %s1431_s28 = sshll.u32 %s2082_s20, 3 }
  0x7a   : > { %s275_s16 = scalar_lea.sflag [#allocation9], %s274_s0  ;;  %s278_s12 = scalar_lea.vmem [#allocation8], %s1431_s28 }
  0x7b   : > { %1820 = dma.done.wait (%p2597_p10), %s275_s16, 128  }
  0x7c   : > { %1822 = vsyncadd (%p2597_p10), %s275_s16, 4294967168  ;;  %p2598_p13 = scmp.eq.s32.totalorder %s1925_s24, 0 }
  0x7e   : > { %1824 = dma.done.wait (%p2598_p13), [#allocation9], 512   ;;  %p2599_p3 = pmov %p2598_p13 }
  0x7f   : > { %v619_v0 = vlaneseq  ;;  %vm323_vm0 = vcmask 261120   ;;  %v341_v2 = vld [vmem:[#allocation10] sm:$0xff]  ;;  %v342_v3 = vld [vmem:[#allocation10 + $0x8] sm:$0xff]  ;;  %v343_v4 = vld [vmem:[#allocation10 + $0x10] sm:$0xff]  ;;  %vm320_vm1 = vcmask 7168   ;;  %vm815_vm2 = vcmask 130112  }
  0x80   : > { %1826 = vsyncadd (%p2599_p3), [#allocation9], 4294966784  ;;  %v1510_v5 = vpack.c.bf16 %v342_v3, %v341_v2  ;;  %v344_v6 = vld [vmem:[#allocation10 + $0x18] sm:$0xff]  ;;  %v2108_v7 = vld [vmem:[%s2086_s2] sm:$0xff]  ;;  %vm880_vm3 = vcmask 1041409   ;;  %vm882_vm4 = vcmask 1042434  }
  0x81   : > { %v2105_v1 = vshrl.u32 %v619_v0, 7  ;;  %v2111_v8 = vld [vmem:[%s2086_s2 + $0x40] sm:$0xff]  ;;  %v1514_v9 = vpack.c.bf16 %v344_v6, %v343_v4  ;;  %1486 = vmatprep.mubr.msk.f32.mxu0 %vm323_vm0, %v2108_v7  ;;  %v2126_v15 = vld [vmem:[%s2086_s2 + $0x8] sm:$0xff]  ;;  %v2132_v17 = vld [vmem:[%s2086_s2 + $0x10] sm:$0xff]  ;;  %vm884_vm5 = vcmask 1043459   ;;  %vm886_vm6 = vcmask 1044484  }
  0x82   : > { %1498 = vmatprep.mubr.msk.f32.mxu1 %vm323_vm0, %v2111_v8  ;;  %1511 = vmatprep.subr.bf16.mxu0 %v1510_v5  ;;  %v2119_v12 = vld [vmem:[%s278_s12] sm:$0xff]  ;;  %v2135_v18 = vld [vmem:[%s2086_s2 + $0x50] sm:$0xff]  ;;  %v2151_v22 = vld [vmem:[%s2086_s2 + $0x18] sm:$0xff]  ;;  %vm888_vm7 = vcmask 1045509   ;;  %vm890_vm8 = vcmask 1046534   ;;  %vm892_vm9 = vcmask 1047559  }
  0x83   : > { %1518 = vmatprep.subr.bf16.mxu1 %v1510_v5  ;;  %v621_v10 = vsub.s32 0, %v2105_v1  ;;  %1513 = vmatpush3.bf16.msra.mxu0 %v1510_v5  ;;  %v632_v11 = vsub.s32 1, %v2105_v1  ;;  %v643_v14 = vsub.s32 2, %v2105_v1  ;;  %v2129_v16 = vld [vmem:[%s2086_s2 + $0x48] sm:$0xff]  ;;  %v654_v21 = vsub.s32 3, %v2105_v1  ;;  %v2156_v23 = vld [vmem:[%s2086_s2 + $0x58] sm:$0xff] }
  0x84   : > { %1520 = vmatpush3.bf16.msra.mxu1 %v1510_v5  ;;  %1515 = vmatprep.subr.bf16.mxu0 %v1514_v9  ;;  %v2159_v24 = vld [vmem:[%s2086_s2 + $0x20] sm:$0xff]  ;;  %v665_v27 = vsub.s32 4, %v2105_v1  ;;  %v2175_v28 = vld [vmem:[%s2086_s2 + $0x28] sm:$0xff]  ;;  %v2183_v30 = vld [vmem:[%s2086_s2 + $0x30] sm:$0xff]  ;;  %v676_v33 = vsub.s32 5, %v2105_v1  ;;  %v2577_v37 = vsub.s32 6, %v2105_v1 }
  0x85   : > { %1519 = vmatprep.subr.bf16.mxu1 %v1514_v9  ;;  %v622_v13 = vrot.slane %v2119_v12, %v621_v10  ;;  %v633_v19 = vrot.slane %v2119_v12, %v632_v11  ;;  %v644_v20 = vrot.slane %v2119_v12, %v643_v14  ;;  %v2162_v25 = vld [vmem:[%s2086_s2 + $0x60] sm:$0xff]  ;;  %v655_v26 = vrot.slane %v2119_v12, %v654_v21  ;;  %v2180_v29 = vld [vmem:[%s2086_s2 + $0x68] sm:$0xff]  ;;  %v2186_v31 = vld [vmem:[%s2086_s2 + $0x70] sm:$0xff]  ;;  %s1453_s10 = sshll.u32 %s1845_s21, 7  ;;  %s313_s14 = scalar_lea.vmem [#allocation11], %s1431_s28 }
  0x86   : > { %v666_v32 = vrot.slane %v2119_v12, %v665_v27  ;;  %v2199_v34 = vld [vmem:[%s2086_s2 + $0x38] sm:$0xff]  ;;  %v677_v36 = vrot.slane %v2119_v12, %v676_v33  ;;  %v688_v38 = vrot.slane %v2119_v12, %v2577_v37  ;;  %v2220_v39 = vld [vmem:[%s2566_s3] ss:$0 sm:$0xff]  ;;  %vm895_vm10 = vcmask 130048   ;;  %s1304_s30 = sshll.u32 %s313_s14, 4  ;;  %s2513_s17 = scalar_lea.hbm %s2568_s5, %s1453_s10  ;;  %s2515_s30 = int_to_ptr.vmem [resolvable:$true] %s1304_s30 }
  0x87   : > { %1517 = vmatpush3.bf16.msra.mxu0 %v1514_v9  ;;  %628 = vbcast.lane.b32.xlu1 %v622_v13, 264  ;;  %v2204_v35 = vld [vmem:[%s2086_s2 + $0x78] sm:$0xff]  ;;  %v2234_v61 = vld [vmem:[%s2567_s4] ss:$0 sm:$0xff]  ;;  %s1291_s9 = scalar_lea.sflag [#allocation7], %s2082_s20  ;;  %s1763_s21 = scalar_lea.vmem %s2515_s30, 128 }
  0x88   : > { %1521 = vmatpush3.bf16.msra.mxu1 %v1514_v9  ;;  %624 = vbcast.lane.b32.xlu0 %v622_v13, 256  ;;  %p1764_p12 = scmp.ne.s32.totalorder %s2515_s30, %s1763_s21  ;;  %p2601_p0 = scmp.ne.s32.totalorder %s2589_s6, 0 }
  0x89   : > { %s1863_s29 = smov [#allocation11]  }
  0x8a   : > { %1487 = vmatmul.mubr.msk.f32.vlgmr.msra.gmra.mrb[0].mxu0 %vm323_vm0, %v2126_v15  ;;  %p1765_p5 = pnand %p1764_p12, %p2601_p0  ;;  %s1767_s11 = sshll.u32 %s1863_s29, 4  ;;  %s1768_s11 = int_to_ptr.vmem [resolvable:$false] %s1767_s11 }
  0x8b   : > { %1499 = vmatmul.mubr.msk.f32.vlgmr.msra.gmra.mrb[0].mxu1 %vm323_vm0, %v2129_v16  ;;  %1489 = vmatprep.mubr.msk.f32.mxu0 %vm323_vm0, %v2132_v17  ;;  %s1769_s8 = scalar_lea.vmem %s1768_s11, 256  ;;  %p1770_p1 = scmp.lt.s32.totalorder %s2515_s30, %s1768_s11 }
  0x8c   : > { %1501 = vmatprep.mubr.msk.f32.mxu1 %vm323_vm0, %v2135_v18  ;;  %635 = vbcast.lane.b32.xlu1 %v633_v19, 256  ;;  %p1766_p9 = pneg %p1765_p5  ;;  %p1771_p2 = scmp.lt.s32.totalorder %s1769_s8, %s1763_s21 }
  0x8d   : > { %646 = vbcast.lane.b32.xlu0 %v644_v20, 256 }
  0x8e   : > { %1490 = vmatmul.mubr.msk.f32.gmra.mrb[2].mxu0 %vm323_vm0, %v2151_v22  ;;  %p1772_p7 = por %p1771_p2, %p1770_p1 }
  0x8f   : > { %1502 = vmatmul.mubr.msk.f32.gmra.mrb[2].mxu1 %vm323_vm0, %v2156_v23  ;;  %1492 = vmatprep.mubr.msk.f32.mxu0 %vm323_vm0, %v2159_v24 }
  0x90   : > { %1504 = vmatprep.mubr.msk.f32.mxu1 %vm323_vm0, %v2162_v25  ;;  %639 = vbcast.lane.b32.xlu1 %v633_v19, 264  ;;  %p1773_p4 = pnand %p1772_p7, %p1766_p9 }
  0x91   : > { %657 = vbcast.lane.b32.xlu0 %v655_v26, 256 }
  0x92   : > { %1493 = vmatmul.mubr.msk.f32.gmra.mrb[4].mxu0 %vm323_vm0, %v2175_v28 }
  0x93   : > { %1505 = vmatmul.mubr.msk.f32.gmra.mrb[4].mxu1 %vm323_vm0, %v2180_v29  ;;  %1495 = vmatprep.mubr.msk.f32.mxu0 %vm323_vm0, %v2183_v30 }
  0x94   : > { %1507 = vmatprep.mubr.msk.f32.mxu1 %vm323_vm0, %v2186_v31  ;;  %650 = vbcast.lane.b32.xlu1 %v644_v20, 264 }
  0x95   : > { %668 = vbcast.lane.b32.xlu0 %v666_v32, 256 }
  0x96   : > { %1496 = vmatmul.mubr.msk.f32.gmra.mrb[6].mxu0 %vm323_vm0, %v2199_v34 }
  0x97   : > { %1508 = vmatmul.mubr.msk.f32.gmra.mrb[6].mxu1 %vm323_vm0, %v2204_v35 }
  0x98   : > { %661 = vbcast.lane.b32.xlu1 %v655_v26, 264 }
  0x99   : > { %679 = vbcast.lane.b32.xlu0 %v677_v36, 256 }
  0x9c   : > { %672 = vbcast.lane.b32.xlu1 %v666_v32, 264 }
  0x9d   : > { %690 = vbcast.lane.b32.xlu0 %v688_v38, 256 }
  0xa0   : > { %683 = vbcast.lane.b32.xlu1 %v677_v36, 264 }
  0xa4   : > { %694 = vbcast.lane.b32.xlu1 %v688_v38, 264 }
 0x15d   : > { %v1488_v40 = vpop.f32.mrb[0].mxu0 }
 0x15e   : > { %v1500_v41 = vpop.f32.mrb[0].mxu1  ;;  %v473_v42 = vadd.f32 %v1488_v40, %v2220_v39  ;;  %v467_v44 = vpop.f32.mrb[1].mxu0 }
 0x15f   : > { %v513_v43 = vadd.f32 %v1500_v41, %v2220_v39  ;;  %v507_v45 = vpop.f32.mrb[1].mxu1  ;;  %v468_v46 = vadd.f32 %v2220_v39, %v467_v44 }
 0x160   : > { %1607 = vtanh.f32 %v473_v42  ;;  %v508_v47 = vadd.f32 %v2220_v39, %v507_v45 }
 0x161   : > { %1609 = vtanh.f32 %v513_v43  ;;  %v1491_v48 = vpop.f32.mrb[2].mxu0 }
 0x162   : > { %v1503_v49 = vpop.f32.mrb[2].mxu1  ;;  %1611 = vtanh.f32 %v468_v46  ;;  %v483_v50 = vadd.f32 %v1491_v48, %v2220_v39  ;;  %v477_v51 = vpop.f32.mrb[3].mxu0 }
 0x163   : > { %v523_v52 = vadd.f32 %v1503_v49, %v2220_v39  ;;  %v517_v53 = vpop.f32.mrb[3].mxu1  ;;  %v478_v59 = vadd.f32 %v2220_v39, %v477_v51 }
 0x164   : > { %1613 = vtanh.f32 %v483_v50  ;;  %v518_v56 = vadd.f32 %v2220_v39, %v517_v53 }
 0x165   : > { %1615 = vtanh.f32 %v508_v47  ;;  %v1494_v54 = vpop.f32.mrb[4].mxu0 }
 0x166   : > { %v1506_v55 = vpop.f32.mrb[4].mxu1  ;;  %1617 = vtanh.f32 %v523_v52  ;;  %v487_v57 = vpop.f32.mrb[5].mxu0  ;;  %v493_v62 = vadd.f32 %v1494_v54, %v2220_v39 }
 0x167   : > { %v527_v58 = vpop.f32.mrb[5].mxu1  ;;  %v488_v60 = vadd.f32 %v2220_v39, %v487_v57  ;;  %1619 = vtanh.f32 %v518_v56  ;;  %v533_v26 = vadd.f32 %v1506_v55, %v2220_v39 }
 0x168   : > { %1621 = vtanh.f32 %v478_v59  ;;  %v528_v20 = vadd.f32 %v2220_v39, %v527_v58  ;;  %v1860_v58 = vmov 0  }
 0x169   : > { %v1497_v63 = vpop.f32.mrb[6].mxu0  ;;  %1623 = vtanh.f32 %v488_v60  ;;  %1605 = vset.pattern.permute.xlu1 %v1860_v58  ;;  %1606 = vset.pattern.permute.xlu0 %v1860_v58 }
 0x16a   : > { %v1509_v2 = vpop.f32.mrb[6].mxu1  ;;  %v1608_v3 = vpop.eup %1607  ;;  %1625 = vtanh.f32 %v493_v62  ;;  %v503_v43 = vadd.f32 %v1497_v63, %v2220_v39 }
 0x16b   : > { %v497_v4 = vpop.f32.mrb[7].mxu0  ;;  %v537_v5 = vpop.f32.mrb[7].mxu1  ;;  %v570_v9 = vmul.f32 %v1608_v3, %v2234_v61  ;;  %1627 = vtanh.f32 %v528_v20  ;;  %v543_v49 = vadd.f32 %v1509_v2, %v2220_v39 }
 0x16c   : > { %v1610_v6 = vpop.eup %1609  ;;  %v498_v42 = vadd.f32 %v2220_v39, %v497_v4  ;;  %1629 = vtanh.f32 %v533_v26  ;;  %v538_v47 = vadd.f32 %v2220_v39, %v537_v5  ;;  %v625_v26 = vpop.permute.xlu0 %624 }
 0x16d   : > { %v1612_v13 = vpop.eup %1611  ;;  %v578_v19 = vmul.f32 %v1610_v6, %v2234_v61  ;;  %587 = vadd.xlane.f32.xlu0 %v570_v9  ;;  %v698_v9 = vsub.s32 7, %v2105_v1 }
 0x16e   : > { %v1614_v32 = vpop.eup %1613  ;;  %v569_v40 = vmul.f32 %v1612_v13, %v2234_v61  ;;  %1631 = vtanh.f32 %v498_v42 }
 0x16f   : > { %603 = vadd.xlane.f32.xlu1 %v578_v19  ;;  %v1616_v36 = vpop.eup %1615  ;;  %v572_v38 = vmul.f32 %v1614_v32, %v2234_v61  ;;  %1633 = vtanh.f32 %v503_v43  ;;  %v699_v13 = vrot.slane %v2119_v12, %v698_v9  ;;  %v629_v19 = vpop.permute.xlu1 %628 }
 0x170   : > { %v1618_v41 = vpop.eup %1617  ;;  %v577_v45 = vmul.f32 %v1616_v36, %v2234_v61  ;;  %1635 = vtanh.f32 %v538_v47  ;;  %v647_v36 = vpop.permute.xlu0 %646 }
 0x171   : > { %585 = vadd.xlane.f32.xlu0 %v569_v40  ;;  %v580_v44 = vmul.f32 %v1618_v41, %v2234_v61  ;;  %v1620_v46 = vpop.eup %1619  ;;  %1637 = vtanh.f32 %v543_v49 }
 0x172   : > { %v1622_v48 = vpop.eup %1621  ;;  %v579_v52 = vmul.f32 %v1620_v46, %v2234_v61 }
 0x173   : > { %591 = vadd.xlane.f32.xlu1 %v572_v38  ;;  %v1624_v50 = vpop.eup %1623  ;;  %v571_v53 = vmul.f32 %v1622_v48, %v2234_v61  ;;  %v636_v20 = vpop.permute.xlu1 %635 }
 0x174   : > { %v1626_v51 = vpop.eup %1625  ;;  %v573_v54 = vmul.f32 %v1624_v50, %v2234_v61  ;;  %v658_v40 = vpop.permute.xlu0 %657 }
 0x175   : > { %601 = vadd.xlane.f32.xlu0 %v577_v45  ;;  %v1628_v55 = vpop.eup %1627  ;;  %v574_v56 = vmul.f32 %v1626_v51, %v2234_v61 }
 0x176   : > { %v1630_v57 = vpop.eup %1629  ;;  %v581_v39 = vmul.f32 %v1628_v55, %v2234_v61 }
 0x177   : > { %607 = vadd.xlane.f32.xlu1 %v580_v44  ;;  %v582_v60 = vmul.f32 %v1630_v57, %v2234_v61  ;;  %v640_v32 = vpop.permute.xlu1 %639 }
 0x178   : > { %v1632_v59 = vpop.eup %1631  ;;  %v669_v42 = vpop.permute.xlu0 %668 }
 0x179   : > { %605 = vadd.xlane.f32.xlu0 %v579_v52  ;;  %v1634_v62 = vpop.eup %1633  ;;  %v575_v63 = vmul.f32 %v1632_v59, %v2234_v61 }
 0x17a   : > { %v1636_v2 = vpop.eup %1635  ;;  %v576_v3 = vmul.f32 %v1634_v62, %v2234_v61 }
 0x17b   : > { %589 = vadd.xlane.f32.xlu1 %v571_v53  ;;  %v1638_v4 = vpop.eup %1637  ;;  %v583_v5 = vmul.f32 %v1636_v2, %v2234_v61  ;;  %v651_v38 = vpop.permute.xlu1 %650 }
 0x17c   : > { %v584_v6 = vmul.f32 %v1638_v4, %v2234_v61  ;;  %v680_v43 = vpop.permute.xlu0 %679 }
 0x17d   : > { %593 = vadd.xlane.f32.xlu0 %v573_v54 }
 0x17f   : > { %595 = vadd.xlane.f32.xlu1 %v574_v56  ;;  %v662_v41 = vpop.permute.xlu1 %661 }
 0x180   : > { %v691_v45 = vpop.permute.xlu0 %690 }
 0x181   : > { %609 = vadd.xlane.f32.xlu0 %v581_v39 }
 0x183   : > { %611 = vadd.xlane.f32.xlu1 %v582_v60  ;;  %v673_v61 = vpop.permute.xlu1 %672 }
 0x185   : > { %597 = vadd.xlane.f32.xlu0 %v575_v63 }
 0x187   : > { %599 = vadd.xlane.f32.xlu1 %v576_v3  ;;  %v684_v44 = vpop.permute.xlu1 %683 }
 0x189   : > { %613 = vadd.xlane.f32.xlu0 %v583_v5 }
 0x18b   : > { %615 = vadd.xlane.f32.xlu1 %v584_v6  ;;  %v695_v46 = vpop.permute.xlu1 %694 }
 0x19c   : > { %705 = vbcast.lane.b32.xlu1 %v699_v13, 264 }
 0x19f   : > { %701 = vbcast.lane.b32.xlu0 %v699_v13, 256 }
 0x1fa   : > { %v588_v47 = vpop.xlane.xlu0 %587 }
 0x1fb   : > { %v2263_v49 = vadd.f32 %v629_v19, %v588_v47 }
 0x1fc   : > { %v604_v48 = vpop.xlane.xlu1 %603 }
 0x1fd   : > { %v2265_v12 = vadd.f32 %v673_v61, %v604_v48  ;;  %760 = vperm.xlu1 %1605, %v2263_v49  }
 0x1fe   : > { %v586_v50 = vpop.xlane.xlu0 %585 }
 0x1ff   : > { %784 = vperm.xlu0 %1606, %v2265_v12   ;;  %v2269_v52 = vadd.f32 %v625_v26, %v586_v50 }
 0x200   : > { %v592_v51 = vpop.xlane.xlu1 %591 }
 0x201   : > { %v2274_v56 = vadd.f32 %v640_v32, %v592_v51 }
 0x202   : > { %v602_v53 = vpop.xlane.xlu0 %601 }
 0x203   : > { %757 = vperm.xlu0 %1606, %v2269_v52   ;;  %v2272_v55 = vadd.f32 %v669_v42, %v602_v53  ;;  %v805_v53 = vand.u32 127, %v619_v0 }
 0x204   : > { %v608_v54 = vpop.xlane.xlu1 %607 }
 0x205   : > { %781 = vperm.xlu1 %1605, %v2272_v55   ;;  %v2278_v58 = vadd.f32 %v684_v44, %v608_v54 }
 0x206   : > { %v606_v57 = vpop.xlane.xlu0 %605 }
 0x207   : > { %766 = vperm.xlu0 %1606, %v2274_v56   ;;  %v2284_v63 = vadd.f32 %v680_v43, %v606_v57 }
 0x208   : > { %v590_v39 = vpop.xlane.xlu1 %589 }
 0x209   : > { %v2280_v59 = vadd.f32 %v636_v20, %v590_v39  ;;  %v810_v39 = vadd.s32 4294967288, %v805_v53 }
 0x20a   : > { %v594_v60 = vpop.xlane.xlu0 %593 }
 0x20b   : > { %790 = vperm.xlu0 %1606, %v2278_v58   ;;  %763 = vperm.xlu1 %1605, %v2280_v59   ;;  %v2290_v5 = vadd.f32 %v647_v36, %v594_v60 }
 0x20c   : > { %v596_v62 = vpop.xlane.xlu1 %595 }
 0x20d   : > { %v2286_v2 = vadd.f32 %v651_v38, %v596_v62 }
 0x20e   : > { %v610_v3 = vpop.xlane.xlu0 %609 }
 0x20f   : > { %772 = vperm.xlu0 %1606, %v2286_v2   ;;  %787 = vperm.xlu1 %1605, %v2284_v63   ;;  %v2296_v20 = vadd.f32 %v691_v45, %v610_v3  ;;  %v2314_v3 = vsub.s32 %v805_v53, %v2105_v1 }
 0x210   : > { %v612_v4 = vpop.xlane.xlu1 %611 }
 0x211   : > { %v2292_v6 = vadd.f32 %v695_v46, %v612_v4  ;;  %v2317_v4 = vsub.s32 %v810_v39, %v2105_v1 }
 0x212   : > { %v598_v13 = vpop.xlane.xlu0 %597 }
 0x213   : > { %796 = vperm.xlu0 %1606, %v2292_v6   ;;  %769 = vperm.xlu1 %1605, %v2290_v5   ;;  %v2302_v36 = vadd.f32 %v658_v40, %v598_v13 }
 0x214   : > { %v600_v19 = vpop.xlane.xlu1 %599 }
 0x215   : > { %v2298_v26 = vadd.f32 %v662_v41, %v600_v19  ;;  %v1861_v41 = vmov -inf  }
 0x216   : > { %v614_v32 = vpop.xlane.xlu0 %613  ;;  %321 = vst.msk [vmem:[#allocation2] sm:$0xff] %vm320_vm1, %v1861_v41 }
 0x217   : > { %778 = vperm.xlu0 %1606, %v2298_v26   ;;  %793 = vperm.xlu1 %1605, %v2296_v20  }
 0x218   : > { %v616_v38 = vpop.xlane.xlu1 %615 }
 0x21a   : > { %v702_v42 = vpop.permute.xlu0 %701 }
 0x21b   : > { %775 = vperm.xlu1 %1605, %v2302_v36   ;;  %v2305_v43 = vadd.f32 %v702_v42, %v614_v32 }
 0x21c   : > { %v706_v61 = vpop.permute.xlu1 %705 }
 0x21d   : > { %v2307_v44 = vadd.f32 %v706_v61, %v616_v38 }
 0x21f   : > { %802 = vperm.xlu0 %1606, %v2307_v44   ;;  %799 = vperm.xlu1 %1605, %v2305_v43  }
 0x27c   : > { %v761_v46 = vpop.permute.xlu1 %760 }
 0x27d   : > { %v814_v41 = vrot.slane %v761_v46, %v2317_v4 }
 0x27e   : > { %v785_v45 = vpop.permute.xlu0 %784 }
 0x27f   : > { %v851_v46 = vrot.slane %v785_v45, %v2317_v4 }
 0x282   : > { %v758_v40 = vpop.permute.xlu0 %757 }
 0x283   : > { %v809_v38 = vrot.slane %v758_v40, %v2314_v3 }
 0x284   : > { %v782_v47 = vpop.permute.xlu1 %781 }
 0x285   : > { %v847_v39 = vrot.slane %v782_v47, %v2314_v3  ;;  %v816_v40 = vsel %vm815_vm2, %v814_v41, %v809_v38 }
 0x286   : > { %v767_v48 = vpop.permute.xlu0 %766 }
 0x287   : > { %v824_v0 = vrot.slane %v767_v48, %v2317_v4 }
 0x28a   : > { %v764_v50 = vpop.permute.xlu1 %763  ;;  %v791_v51 = vpop.permute.xlu0 %790 }
 0x28b   : > { %v820_v13 = vrot.slane %v764_v50, %v2314_v3  ;;  %v860_v47 = vrot.slane %v791_v51, %v2317_v4 }
 0x28d   : > { %v825_v53 = vsel %vm815_vm2, %v824_v0, %v820_v13 }
 0x28e   : > { %v788_v54 = vpop.permute.xlu1 %787  ;;  %v773_v57 = vpop.permute.xlu0 %772  ;;  %v881_v13 = vsel %vm880_vm3, %v825_v53, %v816_v40 }
 0x28f   : > { %v833_v42 = vrot.slane %v773_v57, %v2317_v4  ;;  %v856_v48 = vrot.slane %v788_v54, %v2314_v3  ;;  %v852_v54 = vsel %vm815_vm2, %v851_v46, %v847_v39  ;;  %v2353_v46 = vld [vmem:[#allocation2] sm:$0xff] }
 0x291   : > { %v861_v53 = vsel %vm815_vm2, %v860_v47, %v856_v48  ;;  %v1862_v48 = vmov 0.0  }
 0x292   : > { %v770_v60 = vpop.permute.xlu1 %769  ;;  %v797_v62 = vpop.permute.xlu0 %796  ;;  %324 = vst.msk [vmem:[#allocation4] sm:$0xff] %vm323_vm0, %v1862_v48 }
 0x293   : > { %v829_v19 = vrot.slane %v770_v60, %v2314_v3  ;;  %v869_v38 = vrot.slane %v797_v62, %v2317_v4  ;;  %322 = vst.msk [vmem:[#allocation3] sm:$0xff] %vm320_vm1, %v1862_v48 }
 0x295   : > { %v834_v50 = vsel %vm815_vm2, %v833_v42, %v829_v19 }
 0x296   : > { %v794_v32 = vpop.permute.xlu1 %793  ;;  %v779_v61 = vpop.permute.xlu0 %778  ;;  %v883_v19 = vsel %vm882_vm4, %v834_v50, %v881_v13 }
 0x297   : > { %v842_v57 = vrot.slane %v779_v61, %v2317_v4  ;;  %v865_v0 = vrot.slane %v794_v32, %v2314_v3 }
 0x29a   : > { %v776_v60 = vpop.permute.xlu1 %775 }
 0x29b   : > { %v838_v37 = vrot.slane %v776_v60, %v2314_v3 }
 0x29d   : > { %v843_v42 = vsel %vm815_vm2, %v842_v57, %v838_v37  ;;  %v870_v37 = vsel %vm815_vm2, %v869_v38, %v865_v0 }
 0x29e   : > { %v885_v61 = vsel %vm884_vm5, %v843_v42, %v883_v19  ;;  %v800_v41 = vpop.permute.xlu1 %799  ;;  %v803_v45 = vpop.permute.xlu0 %802 }
 0x29f   : > { %v874_v32 = vrot.slane %v800_v41, %v2314_v3  ;;  %v878_v51 = vrot.slane %v803_v45, %v2317_v4  ;;  %v887_v50 = vsel %vm886_vm6, %v852_v54, %v885_v61 }
 0x2a0   : > { %v889_v60 = vsel %vm888_vm7, %v861_v53, %v887_v50 }
 0x2a1   : > { %v879_v62 = vsel %vm815_vm2, %v878_v51, %v874_v32  ;;  %v891_v39 = vsel %vm890_vm8, %v870_v37, %v889_v60 }
 0x2a2   : > { %v893_v40 = vsel %vm892_vm9, %v879_v62, %v891_v39 }
 0x2a3   : > { %v896_v57 = vsel %vm895_vm10, %v893_v40, -inf }
 0x2a4   : > { %897 = vmax.xlane.f32.xlu1 %v896_v57 }
 0x331   : > { %v898_v13 = vpop.xlane.xlu1 %897 }
 0x332   : > { %v2356_v0 = vmax.f32 %v2353_v46, %v898_v13 }
 0x334   : > { %v900_v47 = vsub.f32 %v2353_v46, %v2356_v0  ;;  %1276 = vst.msk [vmem:[#allocation2] sm:$0xff] %vm320_vm1, %v2356_v0  ;;  %905 = vperm.xlu0 %1606, %v2356_v0  }
 0x3b3   : > { %v906_v19 = vpop.permute.xlu0 %905 }
 0x3b4   : > { %v910_v42 = vrot.slane %v906_v19, %v621_v10  ;;  %v914_v38 = vrot.slane %v906_v19, %v632_v11  ;;  %v926_v61 = vrot.slane %v906_v19, %v665_v27  ;;  %v2375_v10 = vrot.slane %v906_v19, %v698_v9 }
 0x3b5   : > { %v918_v11 = vrot.slane %v906_v19, %v643_v14  ;;  %v922_v9 = vrot.slane %v906_v19, %v654_v21  ;;  %v930_v13 = vrot.slane %v906_v19, %v676_v33 }
 0x3b6   : > { %v947_v54 = vsub.f32 %v2269_v52, %v910_v42  ;;  %v948_v41 = vsub.f32 %v2263_v49, %v910_v42  ;;  %v949_v53 = vsub.f32 %v2280_v59, %v914_v38  ;;  %v955_v32 = vsub.f32 %v2272_v55, %v926_v61 }
 0x3b7   : > { %v950_v50 = vsub.f32 %v2274_v56, %v914_v38  ;;  %v961_v49 = vsub.f32 %v2305_v43, %v2375_v10  ;;  %v951_v55 = vsub.f32 %v2290_v5, %v918_v11  ;;  %v952_v14 = vsub.f32 %v2286_v2, %v918_v11 }
 0x3b8   : > { %v963_v45 = vmul.f32 1.442695, %v947_v54  ;;  %v965_v51 = vmul.f32 1.442695, %v948_v41  ;;  %v967_v52 = vmul.f32 1.442695, %v949_v53  ;;  %v953_v43 = vsub.f32 %v2302_v36, %v922_v9 }
 0x3b9   : > { %v979_v27 = vmul.f32 1.442695, %v955_v32  ;;  %v969_v59 = vmul.f32 1.442695, %v950_v50  ;;  %v991_v60 = vmul.f32 1.442695, %v961_v49  ;;  %v954_v57 = vsub.f32 %v2298_v26, %v922_v9 }
 0x3ba   : > { %1639 = vpow2.f32 %v963_v45  ;;  %v971_v56 = vmul.f32 1.442695, %v951_v55  ;;  %v973_v39 = vmul.f32 1.442695, %v952_v14  ;;  %v975_v48 = vmul.f32 1.442695, %v953_v43 }
 0x3bb   : > { %1641 = vpow2.f32 %v965_v51  ;;  %v956_v42 = vsub.f32 %v2265_v12, %v926_v61  ;;  %v977_v36 = vmul.f32 1.442695, %v954_v57  ;;  %v957_v38 = vsub.f32 %v2284_v63, %v930_v13 }
 0x3bc   : > { %1643 = vpow2.f32 %v967_v52  ;;  %v2600_v45 = vsub.s32 6, %v2105_v1  ;;  %v958_v32 = vsub.f32 %v2278_v58, %v930_v13  ;;  %v962_v1 = vsub.f32 %v2307_v44, %v2375_v10 }
 0x3bd   : > { %1645 = vpow2.f32 %v979_v27  ;;  %v981_v41 = vmul.f32 1.442695, %v956_v42  ;;  %v983_v33 = vmul.f32 1.442695, %v957_v38  ;;  %v901_v49 = vmul.f32 1.442695, %v900_v47 }
 0x3be   : > { %1647 = vpow2.f32 %v969_v59  ;;  %v934_v53 = vrot.slane %v906_v19, %v2600_v45  ;;  %v985_v61 = vmul.f32 1.442695, %v958_v32  ;;  %v993_v27 = vmul.f32 1.442695, %v962_v1 }
 0x3bf   : > { %1649 = vpow2.f32 %v991_v60 }
 0x3c0   : > { %1651 = vpow2.f32 %v971_v56  ;;  %v959_v12 = vsub.f32 %v2296_v20, %v934_v53  ;;  %v960_v63 = vsub.f32 %v2292_v6, %v934_v53 }
 0x3c1   : > { %1653 = vpow2.f32 %v973_v39 }
 0x3c2   : > { %1655 = vpow2.f32 %v975_v48  ;;  %v987_v11 = vmul.f32 1.442695, %v959_v12  ;;  %v989_v58 = vmul.f32 1.442695, %v960_v63 }
 0x3c3   : > { %1657 = vpow2.f32 %v977_v36 }
 0x3c4   : > { %v1640_v37 = vpop.eup %1639  ;;  %1659 = vpow2.f32 %v981_v41 }
 0x3c5   : > { %1014 = vperm.xlu0 %1606, %v1640_v37   ;;  %v1642_v62 = vpop.eup %1641  ;;  %1661 = vpow2.f32 %v983_v33 }
 0x3c6   : > { %v1644_v5 = vpop.eup %1643  ;;  %1663 = vpow2.f32 %v985_v61 }
 0x3c7   : > { %v1646_v40 = vpop.eup %1645  ;;  %1665 = vpow2.f32 %v987_v11 }
 0x3c8   : > { %1038 = vperm.xlu1 %1605, %v1646_v40   ;;  %v1648_v21 = vpop.eup %1647  ;;  %1667 = vpow2.f32 %v989_v58 }
 0x3c9   : > { %1017 = vperm.xlu0 %1606, %v1642_v62   ;;  %v1650_v2 = vpop.eup %1649  ;;  %1669 = vpow2.f32 %v993_v27 }
 0x3ca   : > { %v1652_v54 = vpop.eup %1651  ;;  %1671 = vpow2.f32 %v901_v49 }
 0x3cb   : > { %v1654_v26 = vpop.eup %1653 }
 0x3cc   : > { %1056 = vperm.xlu1 %1605, %v1650_v2   ;;  %v1656_v51 = vpop.eup %1655 }
 0x3cd   : > { %1020 = vperm.xlu0 %1606, %v1644_v5   ;;  %v1658_v52 = vpop.eup %1657 }
 0x3ce   : > { %v1660_v50 = vpop.eup %1659 }
 0x3cf   : > { %v1662_v19 = vpop.eup %1661 }
 0x3d0   : > { %v1664_v20 = vpop.eup %1663 }
 0x3d1   : > { %1023 = vperm.xlu0 %1606, %v1648_v21   ;;  %v1666_v6 = vpop.eup %1665 }
 0x3d2   : > { %v1668_v55 = vpop.eup %1667 }
 0x3d3   : > { %v1670_v59 = vpop.eup %1669 }
 0x3d4   : > { %v2402_v44 = vpop.eup %1671 }
 0x3d5   : > { %1026 = vperm.xlu0 %1606, %v1652_v54  }
 0x3d9   : > { %1029 = vperm.xlu0 %1606, %v1654_v26  }
 0x3dd   : > { %1032 = vperm.xlu0 %1606, %v1656_v51  }
 0x3e1   : > { %1035 = vperm.xlu0 %1606, %v1658_v52  }
 0x3e5   : > { %1041 = vperm.xlu0 %1606, %v1660_v50  }
 0x3e9   : > { %1044 = vperm.xlu0 %1606, %v1662_v19  }
 0x3ed   : > { %1047 = vperm.xlu0 %1606, %v1664_v20  }
 0x3f1   : > { %1050 = vperm.xlu0 %1606, %v1666_v6  }
 0x3f5   : > { %1053 = vperm.xlu0 %1606, %v1668_v55  }
 0x3f9   : > { %1059 = vperm.xlu0 %1606, %v1670_v59  }
 0x3fd   : > { %1150 = vperm.xlu0 %1606, %v2402_v44  }
 0x444   : > { %v1015_v10 = vpop.permute.xlu0 %1014 }
 0x445   : > { %v1170_v47 = vmul.f32 %v1015_v10, %v2108_v7 }
 0x447   : > { %v1186_v5 = vsel %vm323_vm0, %v1170_v47, 0.0  ;;  %v2422_v21 = vpop.permute.xlu1 %1038 }
 0x448   : > { %v1018_v37 = vpop.permute.xlu0 %1017  ;;  %v1178_v38 = vmul.f32 %v2422_v21, %v2111_v8  ;;  %v1064_v8 = vrot.slane %v1015_v10, %v2314_v3  ;;  %v1100_v49 = vrot.slane %v2422_v21, %v2314_v3 }
 0x449   : > { %v1171_v0 = vmul.f32 %v1018_v37, %v2126_v15  ;;  %v1068_v32 = vrot.slane %v1018_v37, %v2317_v4 }
 0x44a   : > { %v1222_v51 = vsel %vm323_vm0, %v1178_v38, 0.0 }
 0x44b   : > { %v1187_v43 = vsel %vm323_vm0, %v1171_v0, 0.0  ;;  %v2447_v63 = vpop.permute.xlu1 %1056  ;;  %v1069_v19 = vsel %vm815_vm2, %v1068_v32, %v1064_v8 }
 0x44c   : > { %v1021_v60 = vpop.permute.xlu0 %1020  ;;  %v1188_v57 = vadd.f32 %v1187_v43, %v1186_v5  ;;  %v1184_v59 = vmul.f32 %v2447_v63, %v2186_v31  ;;  %v1127_v43 = vrot.slane %v2447_v63, %v2314_v3 }
 0x44d   : > { %v1172_v39 = vmul.f32 %v1021_v60, %v2132_v17  ;;  %v1073_v11 = vrot.slane %v1021_v60, %v2314_v3 }
 0x44e   : > { %v1189_v42 = vrot.slane %v1188_v57, 4 }
 0x44f   : > { %v1195_v7 = vsel %vm323_vm0, %v1172_v39, 0.0 }
 0x450   : > { %v1024_v9 = vpop.permute.xlu0 %1023  ;;  %v1190_v33 = vadd.f32 %v1189_v42, %v1188_v57 }
 0x451   : > { %v1173_v62 = vmul.f32 %v1024_v9, %v2151_v22 }
 0x452   : > { %v1191_v27 = vrot.slane %v1190_v33, 2 }
 0x453   : > { %v1196_v48 = vsel %vm323_vm0, %v1173_v62, 0.0 }
 0x454   : > { %v2405_v14 = vpop.permute.xlu0 %1026  ;;  %v1197_v2 = vadd.f32 %v1196_v48, %v1195_v7 }
 0x455   : > { %v1174_v22 = vmul.f32 %v2405_v14, %v2159_v24 }
 0x457   : > { %v1204_v24 = vsel %vm323_vm0, %v1174_v22, 0.0 }
 0x458   : > { %v2407_v46 = vpop.permute.xlu0 %1029 }
 0x459   : > { %v1175_v15 = vmul.f32 %v2407_v46, %v2175_v28 }
 0x45b   : > { %v1205_v36 = vsel %vm323_vm0, %v1175_v15, 0.0 }
 0x45c   : > { %v2411_v56 = vpop.permute.xlu0 %1032  ;;  %v1206_v26 = vadd.f32 %v1205_v36, %v1204_v24 }
 0x45d   : > { %v1176_v54 = vmul.f32 %v2411_v56, %v2183_v30 }
 0x45e   : > { %v1207_v1 = vrot.slane %v1206_v26, 4 }
 0x45f   : > { %v1213_v30 = vsel %vm323_vm0, %v1176_v54, 0.0 }
 0x460   : > { %v2417_v40 = vpop.permute.xlu0 %1035  ;;  %v1208_v0 = vadd.f32 %v1207_v1, %v1206_v26 }
 0x461   : > { %v1177_v17 = vmul.f32 %v2417_v40, %v2199_v34  ;;  %v1198_v34 = vrot.slane %v1197_v2, 4  ;;  %v1095_v31 = vrot.slane %v2417_v40, %v2317_v4 }
 0x462   : > { %v1209_v42 = vrot.slane %v1208_v0, 2 }
 0x463   : > { %v1214_v41 = vsel %vm323_vm0, %v1177_v17, 0.0  ;;  %v1199_v50 = vadd.f32 %v1198_v34, %v1197_v2  ;;  %v1249_v17 = vsel %vm323_vm0, %v1184_v59, 0.0 }
 0x464   : > { %v2429_v13 = vpop.permute.xlu0 %1041  ;;  %v1215_v12 = vadd.f32 %v1214_v41, %v1213_v30 }
 0x465   : > { %v1179_v28 = vmul.f32 %v2429_v13, %v2129_v16  ;;  %v1077_v16 = vrot.slane %v1024_v9, %v2317_v4  ;;  %v1200_v9 = vrot.slane %v1199_v50, 2  ;;  %v1104_v48 = vrot.slane %v2429_v13, %v2317_v4 }
 0x466   : > { %v1216_v55 = vrot.slane %v1215_v12, 4 }
 0x467   : > { %v1223_v45 = vsel %vm323_vm0, %v1179_v28, 0.0  ;;  %v1078_v6 = vsel %vm815_vm2, %v1077_v16, %v1073_v11  ;;  %v1201_v2 = vadd.f32 %v1200_v9, %v1199_v50  ;;  %v1105_v41 = vsel %vm815_vm2, %v1104_v48, %v1100_v49 }
 0x468   : > { %v1045_v53 = vpop.permute.xlu0 %1044  ;;  %v1224_v61 = vadd.f32 %v1223_v45, %v1222_v51  ;;  %v1133_v39 = vsel %vm880_vm3, %v1078_v6, %v1069_v19  ;;  %v1217_v57 = vadd.f32 %v1216_v55, %v1215_v12  ;;  %v1210_v16 = vadd.f32 %v1209_v42, %v1208_v0 }
 0x469   : > { %v1180_v52 = vmul.f32 %v1045_v53, %v2135_v18  ;;  %v1086_v18 = vrot.slane %v2407_v46, %v2317_v4  ;;  %v1192_v46 = vadd.f32 %v1191_v27, %v1190_v33  ;;  %v1109_v28 = vrot.slane %v1045_v53, %v2314_v3 }
 0x46a   : > { %v1225_v10 = vrot.slane %v1224_v61, 4  ;;  %v1218_v24 = vrot.slane %v1217_v57, 2 }
 0x46b   : > { %v1231_v37 = vsel %vm323_vm0, %v1180_v52, 0.0 }
 0x46c   : > { %v1048_v58 = vpop.permute.xlu0 %1047  ;;  %v1226_v21 = vadd.f32 %v1225_v10, %v1224_v61  ;;  %v1202_v61 = vrot.slane %v1201_v2, 1  ;;  %v1219_v52 = vadd.f32 %v1218_v24, %v1217_v57 }
 0x46d   : > { %v1181_v20 = vmul.f32 %v1048_v58, %v2156_v23  ;;  %v1082_v23 = vrot.slane %v2405_v14, %v2314_v3  ;;  %v1091_v14 = vrot.slane %v2411_v56, %v2314_v3  ;;  %v1113_v7 = vrot.slane %v1048_v58, %v2317_v4 }
 0x46e   : > { %v1227_v34 = vrot.slane %v1226_v21, 2  ;;  %v1220_v55 = vrot.slane %v1219_v52, 1 }
 0x46f   : > { %v1232_v60 = vsel %vm323_vm0, %v1181_v20, 0.0  ;;  %v1087_v5 = vsel %vm815_vm2, %v1086_v18, %v1082_v23  ;;  %v1096_v54 = vsel %vm815_vm2, %v1095_v31, %v1091_v14  ;;  %v1114_v26 = vsel %vm815_vm2, %v1113_v7, %v1109_v28  ;;  %v1147_v7 = vld [vmem:[#allocation4] sm:$0xff] }
 0x470   : > { %v1233_v47 = vadd.f32 %v1232_v60, %v1231_v37  ;;  %v1051_v62 = vpop.permute.xlu0 %1050  ;;  %v1134_v56 = vsel %vm882_vm4, %v1087_v5, %v1133_v39  ;;  %v1228_v50 = vadd.f32 %v1227_v34, %v1226_v21  ;;  %v1193_v18 = vrot.slane %v1192_v46, 1 }
 0x471   : > { %v1182_v22 = vmul.f32 %v1051_v62, %v2162_v25  ;;  %v1118_v25 = vrot.slane %v1051_v62, %v2314_v3  ;;  %v1135_v53 = vsel %vm884_vm5, %v1096_v54, %v1134_v56  ;;  %v1203_v60 = vadd.f32 %v1202_v61, %v1201_v2 }
 0x472   : > { %v1234_v15 = vrot.slane %v1233_v47, 4  ;;  %v1136_v3 = vsel %vm886_vm6, %v1105_v41, %v1135_v53  ;;  %v1229_v37 = vrot.slane %v1228_v50, 1  ;;  %v1194_v62 = vadd.f32 %v1193_v18, %v1192_v46 }
 0x473   : > { %v1240_v45 = vsel %vm323_vm0, %v1182_v22, 0.0  ;;  %v1137_v11 = vsel %vm888_vm7, %v1114_v26, %v1136_v3 }
 0x474   : > { %v1235_v40 = vadd.f32 %v1234_v15, %v1233_v47  ;;  %v1054_v36 = vpop.permute.xlu0 %1053  ;;  %v1230_v5 = vadd.f32 %v1229_v37, %v1228_v50  ;;  %v1266_v57 = vsel %vm880_vm3, %v1203_v60, %v1194_v62 }
 0x475   : > { %v1122_v13 = vrot.slane %v1054_v36, %v2317_v4  ;;  %v1183_v38 = vmul.f32 %v1054_v36, %v2180_v29 }
 0x476   : > { %v1236_v33 = vrot.slane %v1235_v40, 2 }
 0x477   : > { %v1241_v32 = vsel %vm323_vm0, %v1183_v38, 0.0  ;;  %v1123_v29 = vsel %vm815_vm2, %v1122_v13, %v1118_v25  ;;  %v995_v38 = vld [vmem:[#allocation3] sm:$0xff] }
 0x478   : > { %v1242_v30 = vadd.f32 %v1241_v32, %v1240_v45  ;;  %v1060_v51 = vpop.permute.xlu0 %1059  ;;  %v1138_v19 = vsel %vm890_vm8, %v1123_v29, %v1137_v11  ;;  %v1237_v27 = vadd.f32 %v1236_v33, %v1235_v40  ;;  %v996_v56 = vmul.f32 %v2402_v44, %v995_v38 }
 0x479   : > { %v1131_v12 = vrot.slane %v1060_v51, %v2317_v4  ;;  %v1185_v8 = vmul.f32 %v1060_v51, %v2204_v35  ;;  %v1211_v35 = vrot.slane %v1210_v16, 1 }
 0x47a   : > { %v1243_v63 = vrot.slane %v1242_v30, 4  ;;  %v1238_v9 = vrot.slane %v1237_v27, 1 }
 0x47b   : > { %v1250_v1 = vsel %vm323_vm0, %v1185_v8, 0.0  ;;  %v1132_v58 = vsel %vm815_vm2, %v1131_v12, %v1127_v43  ;;  %v1212_v47 = vadd.f32 %v1211_v35, %v1210_v16  ;;  %v1221_v43 = vadd.f32 %v1220_v55, %v1219_v52 }
 0x47c   : > { %v1244_v20 = vadd.f32 %v1243_v63, %v1242_v30  ;;  %v1251_v49 = vadd.f32 %v1250_v1, %v1249_v17  ;;  %v1139_v4 = vsel %vm892_vm9, %v1132_v58, %v1138_v19  ;;  %v1239_v48 = vadd.f32 %v1238_v9, %v1237_v27  ;;  %v1151_v2 = vpop.permute.xlu0 %1150 }
 0x47d   : > { %v1141_v6 = vsel %vm895_vm10, %v1139_v4, 0.0  ;;  %v1267_v21 = vsel %vm882_vm4, %v1212_v47, %v1266_v57  ;;  %v1153_v54 = vmul.f32 %v1151_v2, %v1147_v7 }
 0x47e   : > { %v1245_v59 = vrot.slane %v1244_v20, 2  ;;  %v1252_v10 = vrot.slane %v1251_v49, 4  ;;  %1142 = vadd.xlane.f32.xlu1 %v1141_v6  ;;  %v1268_v17 = vsel %vm884_vm5, %v1221_v43, %v1267_v21 }
 0x47f   : > { %v1269_v42 = vsel %vm886_vm6, %v1230_v5, %v1268_v17 }
 0x480   : > { %v1246_v23 = vadd.f32 %v1245_v59, %v1244_v20  ;;  %v1253_v0 = vadd.f32 %v1252_v10, %v1251_v49  ;;  %v1270_v46 = vsel %vm888_vm7, %v1239_v48, %v1269_v42 }
 0x482   : > { %v1247_v39 = vrot.slane %v1246_v23, 1  ;;  %v1254_v31 = vrot.slane %v1253_v0, 2 }
 0x484   : > { %v1255_v15 = vadd.f32 %v1254_v31, %v1253_v0  ;;  %v1248_v14 = vadd.f32 %v1247_v39, %v1246_v23 }
 0x486   : > { %v1256_v22 = vrot.slane %v1255_v15, 1  ;;  %v1271_v36 = vsel %vm890_vm8, %v1248_v14, %v1270_v46 }
 0x488   : > { %v1257_v40 = vadd.f32 %v1256_v22, %v1255_v15 }
 0x48a   : > { %v1272_v28 = vsel %vm892_vm9, %v1257_v40, %v1271_v36 }
 0x48b   : > { %v1274_v13 = vadd.f32 %v1272_v28, %v1153_v54 }
 0x48d   : > { %1275 = vst.msk [vmem:[#allocation4] sm:$0xff] %vm323_vm0, %v1274_v13 }
 0x494   : > { %v1282_v26 = vld [vmem:[#allocation4] sm:$0xff] }
 0x50b   : > { %v1143_v24 = vpop.xlane.xlu1 %1142 }
 0x50c   : > { %v1144_v41 = vadd.f32 %v1143_v24, %v996_v56 }
 0x50e   : > { %1146 = vst.msk [vmem:[#allocation3] sm:$0xff] %vm320_vm1, %v1144_v41 }
 0x515   : > { %v1280_v25 = vld [vmem:[#allocation3] sm:$0xff] }
 0x516   : > { %1673 = vrcp.f32 %v1280_v25 }
 0x520   : > { %v1674_v34 = vpop.eup %1673 }
 0x521   : > { %1285 = vperm.xlu0 %1606, %v1674_v34  }
 0x5a0   : > { %v1286_v45 = vpop.permute.xlu0 %1285 }
 0x5a1   : > { %v1288_v32 = vmul.f32 %v1286_v45, %v1282_v26 }
 0x5a3   : > { %1289 = vst.msk [vmem:[%s313_s14] sm:$0xff] %vm323_vm0, %v1288_v32 }
 0x5a4   : > { %1776 = shalt.err (!%p1773_p4)
}
 0x5a5   : > { %s1777_s20 = scalar_lea.hbm %s2513_s17, 128  ;;  %s1781_s28 = scalar_lea.hbm %s2568_s5, 256 }
 0x5a6   : > { %p1778_p8 = scmp.ne.s32.totalorder %s2513_s17, %s1777_s20  ;;  %p1782_p10 = scmp.lt.u32.totalorder %s2513_s17, %s2568_s5 }
 0x5a7   : > { %p1783_p13 = scmp.lt.u32.totalorder %s1781_s28, %s1777_s20  ;;  %p1785_p12 = scmp.lt.u32.totalorder %s1777_s20, %s2513_s17 }
 0x5a8   : > { %p1779_p11 = pnand %p1778_p8, %p2601_p0 }
 0x5a9   : > { %p1784_p3 = por %p1783_p13, %p1782_p10 }
 0x5aa   : > { %p1780_p6 = pneg %p1779_p11 }
 0x5ab   : > { %p1786_p5 = por %p1785_p12, %p1784_p3 }
 0x5ad   : > { %p1787_p9 = pnand %p1786_p5, %p1780_p6 }
 0x5af   : > { %1790 = shalt.err (!%p1787_p9)
}
 0x5b0   : > { %1530 = dma.vmem_to_hbm [thread:$0]  (%p2601_p0), %s2515_s30, 128, %s2513_s17, %s1291_s9  }
 0x5b1 PF: > { %s1316_s24 = sand.u32 1, %s1833_s18   ;;  %p2602_p1 = scmp.ne.s32.totalorder %s2582_s27, 0 }
 0x5b2   : > { %p2603_p2 = scmp.ge.s32.totalorder %s1853_s23, 2  ;;  %s1317_s26 = scalar_lea.sflag [#allocation7], %s1316_s24 }
 0x5b4   : > { %p1544_p7 = pnand %p2603_p2, %p2602_p1 }
 0x5b6   : > { %1828 = dma.done.wait (!%p1544_p7), %s1317_s26, 128  }
 0x5b7   : > { %1830 = vsyncadd (!%p1544_p7), %s1317_s26, 4294967168  ;;  %s24_s23 = sadd.s32 1, %s1853_s23   ;;  %s2604_s15 = sld [smem:[#allocation16_spill]] }
 0x5b8   : > { %p21_p4 = scmp.ge.s32.totalorder %s24_s23, 4   ;;  %s2605_s20 = sld [smem:[#allocation18_spill]] }
 0x5b9   : > { %s2606_s6 = sld [smem:[#allocation17_spill]]  ;;  %s2607_s18 = smov %s1837_s19 }
 0x5ba   : > { %s2609_s21 = smov %s1849_s22  ;;  %23 = sbr.rel (!%p21_p4) target bundleno = 11 (0xb), region = 110 }
 0x5bd   : > { %s2608_s19 = smov %s2604_s15 }
 0x5bf   : > { %s2610_s22 = smov %s2606_s6 }
 0x5c1   :  { %1322 = vsyncpa [#allocation6], 1 }
 0x5c2   :  { %1324 = vsyncpa [#allocation6 + $0x1], 1 }
 0x5c3   :  { %1325 = vsyncpa [#allocation9], 1 }
 0x5c4   :  { %1327 = vsyncpa [#allocation9 + $0x1], 1 }
 0x5c5   :  { %1328 = vsyncpa [#allocation7], 1 }
 0x5c6   :  { %1330 = vsyncpa [#allocation7 + $0x1], 1 }

</bundles_post_ra>
